<compile_context>
chip_gen: v6e
topology: v6e:2x2x1
jax: 0.10.0
libtpu: 0.0.40
codegen_flags: <defaults>
</compile_context>

<pallas_src>
import functools

import jax
import jax.numpy as jnp
import numpy as np
from jax.experimental import pallas as pl
from jax.experimental.pallas import tpu as pltpu


def _conv_mm_kernel(w_ref, p_ref, o_ref, acc_ref):
    """acc (Coutp, TM) += W (Coutp, TK) @ P^T (TK, TM); bias is folded into W;
    ReLU + store on the last K step (lane-dense (Coutp, TM) output tile)."""
    k = pl.program_id(1)

    @pl.when(k == 0)
    def _():
        acc_ref[...] = jnp.zeros_like(acc_ref)

    acc_ref[...] += jnp.dot(
        w_ref[...], p_ref[...], preferred_element_type=jnp.float32
    )

    @pl.when(k == pl.num_programs(1) - 1)
    def _():
        o_ref[...] = jnp.maximum(acc_ref[...], 0.0).astype(o_ref.dtype)


def _im2col_t(x, kernel_size, stride, padding):
    """x: (N, Cin, D, H, W) -> patches^T (Cin*kd*kh*kw, N*Do*Ho*Wo).

    K order (Cin-major, tap-minor) matches w.reshape(Cout, K); M order is
    n-major then (Do, Ho, Wo) row-major, matching the final NCDHW reshape.
    """
    N, Cin, D, H, W = x.shape
    kd, kh, kw = kernel_size
    sd, sh, sw = stride
    pd, ph, pw = padding
    Do = (D + 2 * pd - kd) // sd + 1
    Ho = (H + 2 * ph - kh) // sh + 1
    Wo = (W + 2 * pw - kw) // sw + 1

    xp = jnp.pad(x, ((0, 0), (0, 0), (pd, pd), (ph, ph), (pw, pw)))
    cols = []
    for a in range(kd):
        for b in range(kh):
            for c in range(kw):
                cols.append(
                    xp[:, :, a:a + sd * Do:sd, b:b + sh * Ho:sh, c:c + sw * Wo:sw]
                )
    patches = jnp.stack(cols, axis=2)                 # (N, Cin, T, Do, Ho, Wo)
    K = Cin * kd * kh * kw
    patches = patches.reshape(N, K, Do * Ho * Wo)     # (N, K, S)
    patches_t = jnp.transpose(patches, (1, 0, 2)).reshape(K, N * Do * Ho * Wo)
    return patches_t, (Do, Ho, Wo)


@functools.partial(jax.jit, static_argnames=("kernel_size", "stride", "tm"))
def conv_cell3d_forward(x, w, b, *, kernel_size, stride, tm=512):
    """ConvCell3d forward: Conv3d(kernel, stride, padding=kernel//2) + ReLU.

    x: (N, Cin, D, H, W)  w: (Cout, Cin, kd, kh, kw)  b: (Cout,)
    returns: (N, Cout, Do, Ho, Wo)   (NCDHW, like PyTorch)
    """
    N, Cin, D, H, W = x.shape
    Cout = w.shape[0]
    kd, kh, kw = kernel_size
    padding = (kd // 2, kh // 2, kw // 2)

    patches_t, (Do, Ho, Wo) = _im2col_t(x, kernel_size, stride, padding)
    K, M = patches_t.shape

    # Pad: K + 1 (bias row) rounded to a lane multiple of 128; M (lane axis of
    # the output) to a multiple of the tile; Cout to a sublane multiple of 8.
    Kp = ((K + 1 + 127) // 128) * 128
    Mp = ((M + tm - 1) // tm) * tm
    Coutp = ((Cout + 7) // 8) * 8

    patches_t = jnp.pad(patches_t, ((0, Kp - K), (0, Mp - M)))
    patches_t = patches_t.at[K, :].set(jnp.asarray(1.0, x.dtype))  # bias column

    w2 = w.reshape(Cout, K).astype(x.dtype)
    w2 = jnp.pad(w2, ((0, Coutp - Cout), (0, Kp - K)))
    w2 = w2.at[:Cout, K].set(b.astype(x.dtype))       # fold bias into the matmul

    # K tile: largest multiple of 128 (<= 1024) that divides Kp, so big-Cin
    # cases stay within VMEM (esp. v7x's 64 MiB) via the K-reduction grid.
    if Kp <= 1024:
        tk = Kp
    else:
        tk = 1024
        while Kp % tk != 0:
            tk -= 128

    grid = (Mp // tm, Kp // tk)

    out_t = pl.pallas_call(
        _conv_mm_kernel,
        out_shape=jax.ShapeDtypeStruct((Coutp, Mp), x.dtype),
        grid=grid,
        in_specs=[
            pl.BlockSpec((Coutp, tk), lambda i, k: (0, k)),   # weights (+bias)
            pl.BlockSpec((tk, tm), lambda i, k: (k, i)),      # patches^T
        ],
        out_specs=pl.BlockSpec((Coutp, tm), lambda i, k: (0, i)),
        scratch_shapes=[pltpu.VMEM((Coutp, tm), jnp.float32)],
        compiler_params=pltpu.CompilerParams(
            dimension_semantics=("parallel", "arbitrary"),
        ),
    )(w2, patches_t)

    out = out_t[:Cout, :M].reshape(Cout, N, Do, Ho, Wo)
    return jnp.transpose(out, (1, 0, 2, 3, 4))        # back to NCDHW


def _reference(x, w, b, kernel_size, stride):
    kd, kh, kw = kernel_size
    pad = [(kd // 2, kd // 2), (kh // 2, kh // 2), (kw // 2, kw // 2)]
    y = jax.lax.conv_general_dilated(
        x, w, window_strides=stride, padding=pad,
        dimension_numbers=("NCDHW", "OIDHW", "NCDHW"),
    )
    y = y + b.reshape(1, -1, 1, 1, 1)
    return jnp.maximum(y, 0.0)


if __name__ == "__main__":
    # Module config: ConvCell3d(in_channels=4, out_channels=8, kernel_size=(3,3,3),
    #                           stride=(1,1,1), use_relu_act=True, use_batch_norm=False)
    in_channels, out_channels = 4, 8
    kernel_size = (3, 3, 3)
    stride = (1, 1, 1)

    N, D, H, W = 2, 8, 8, 8

    key = jax.random.PRNGKey(0)
    kx, kw_, kb = jax.random.split(key, 3)
    x = jax.random.normal(kx, (N, in_channels, D, H, W), dtype=jnp.float32)

    # Deterministic Conv3d parameter init (PyTorch-style uniform(-bound, bound)).
    fan_in = in_channels * kernel_size[0] * kernel_size[1] * kernel_size[2]
    bound = 1.0 / np.sqrt(fan_in)
    w = jax.random.uniform(
        kw_, (out_channels, in_channels) + kernel_size,
        minval=-bound, maxval=bound, dtype=jnp.float32)
    b = jax.random.uniform(
        kb, (out_channels,), minval=-bound, maxval=bound, dtype=jnp.float32)

    y = conv_cell3d_forward(x, w, b, kernel_size=kernel_size, stride=stride)
    y = jax.block_until_ready(y)

    y_ref = jax.block_until_ready(_reference(x, w, b, kernel_size, stride))
    assert y.shape == y_ref.shape, (y.shape, y_ref.shape)
    np.testing.assert_allclose(np.asarray(y), np.asarray(y_ref), rtol=1e-4, atol=1e-4)

    print("KERNEL_OK")
</pallas_src>

<mosaic_0001>
module attributes {stable_mosaic.version = 11 : i64} {
  func.func @_conv_mm_kernel(%arg0: i32, %arg1: i32, %arg2: memref<8x128xf32, #tpu.memory_space<vmem>>, %arg3: memref<128x512xf32, #tpu.memory_space<vmem>>, %arg4: memref<8x512xf32, #tpu.memory_space<vmem>>, %arg5: memref<8x512xf32, #tpu.memory_space<vmem>>) attributes {dimension_semantics = [#tpu.dimension_semantics<parallel>, #tpu.dimension_semantics<arbitrary>], iteration_bounds = array<i64: 2, 1>, scalar_prefetch = 0 : i64, scratch_operands = 1 : i64, tpu.core_type = #tpu.core_type<tc>, window_params = [{transform_indices = @transform_0, window_bounds = array<i64: 8, 128>}, {transform_indices = @transform_1, window_bounds = array<i64: 128, 512>}, {transform_indices = @transform_2, window_bounds = array<i64: 8, 512>}]} {
    %c0_i32 = arith.constant 0 : i32
    %0 = arith.cmpi eq, %arg1, %c0_i32 : i32
    %1 = arith.extui %0 : i1 to i32
    %c0_i32_0 = arith.constant 0 : i32
    %2 = arith.cmpi ne, %1, %c0_i32_0 : i32
    scf.if %2 {
      %cst_10 = arith.constant 0.000000e+00 : f32
      %12 = vector.broadcast %cst_10 : f32 to vector<8x512xf32>
      %c0_11 = arith.constant 0 : index
      %c0_12 = arith.constant 0 : index
      %13 = vector.load %arg5[%c0_11, %c0_12] : memref<8x512xf32, #tpu.memory_space<vmem>>, vector<8x512xf32>
      tpu.vector_store %arg5[%c0_11, %c0_12], %12 {strides = array<i32>} : memref<8x512xf32, #tpu.memory_space<vmem>>, vector<8x512xf32>,
    } else {
    }
    %c0 = arith.constant 0 : index
    %c0_1 = arith.constant 0 : index
    %3 = vector.load %arg5[%c0, %c0_1] : memref<8x512xf32, #tpu.memory_space<vmem>>, vector<8x512xf32>
    %c0_2 = arith.constant 0 : index
    %c0_3 = arith.constant 0 : index
    %4 = vector.load %arg2[%c0_2, %c0_3] : memref<8x128xf32, #tpu.memory_space<vmem>>, vector<8x128xf32>
    %c0_4 = arith.constant 0 : index
    %c0_5 = arith.constant 0 : index
    %5 = vector.load %arg3[%c0_4, %c0_5] : memref<128x512xf32, #tpu.memory_space<vmem>>, vector<128x512xf32>
    %cst = arith.constant dense<0.000000e+00> : vector<8x512xf32>
    %6 = tpu.matmul %4, %5, %cst {dimension_numbers = #tpu.dot_dimension_numbers<[1], [0], [0], [1], [0, 0, 1, 1], [], []>} : vector<8x128xf32>, vector<128x512xf32>, vector<8x512xf32> -> vector<8x512xf32>
    %7 = arith.addf %3, %6 : vector<8x512xf32>
    %c0_6 = arith.constant 0 : index
    %c0_7 = arith.constant 0 : index
    %8 = vector.load %arg5[%c0_6, %c0_7] : memref<8x512xf32, #tpu.memory_space<vmem>>, vector<8x512xf32>
    tpu.vector_store %arg5[%c0_6, %c0_7], %7 {strides = array<i32>} : memref<8x512xf32, #tpu.memory_space<vmem>>, vector<8x512xf32>,
    %c0_i32_8 = arith.constant 0 : i32
    %9 = arith.cmpi eq, %arg1, %c0_i32_8 : i32
    %10 = arith.extui %9 : i1 to i32
    %c0_i32_9 = arith.constant 0 : i32
    %11 = arith.cmpi ne, %10, %c0_i32_9 : i32
    scf.if %11 {
      %c0_10 = arith.constant 0 : index
      %c0_11 = arith.constant 0 : index
      %12 = vector.load %arg5[%c0_10, %c0_11] : memref<8x512xf32, #tpu.memory_space<vmem>>, vector<8x512xf32>
      %cst_12 = arith.constant 0.000000e+00 : f32
      %13 = vector.broadcast %cst_12 : f32 to vector<8x512xf32>
      %14 = arith.maximumf %12, %13 : vector<8x512xf32>
      %c0_13 = arith.constant 0 : index
      %c0_14 = arith.constant 0 : index
      %15 = vector.load %arg4[%c0_13, %c0_14] : memref<8x512xf32, #tpu.memory_space<vmem>>, vector<8x512xf32>
      tpu.vector_store %arg4[%c0_13, %c0_14], %14 {strides = array<i32>} : memref<8x512xf32, #tpu.memory_space<vmem>>, vector<8x512xf32>,
    } else {
    }
    return
  }
  func.func @transform_0(%arg0: i32, %arg1: i32) -> (i32, i32) {
    %c0_i32 = arith.constant 0 : i32
    %c0_i32_0 = arith.constant 0 : i32
    return %c0_i32, %arg1 : i32, i32
  }
  func.func @transform_1(%arg0: i32, %arg1: i32) -> (i32, i32) {
    %c0_i32 = arith.constant 0 : i32
    return %arg1, %arg0 : i32, i32
  }
  func.func @transform_2(%arg0: i32, %arg1: i32) -> (i32, i32) {
    %c0_i32 = arith.constant 0 : i32
    %c0_i32_0 = arith.constant 0 : i32
    return %c0_i32, %arg0 : i32, i32
  }
}

</mosaic_0001>

<bundles_post_ra>
// kernel: conv_cell3d_forward.1
= control target key start
LH: loop header
LB: loop body
LE: loop exit
PB: predicated region body
PF: predicated region fallthrough
CT: control target
= control target key end

     0   :  { %s770_s9 = smov 0   ;;  %s772_s10 = smov 0   ;;  %s1036_s0 = inlined_call_operand.vmem [shape: f32[8,128], index: 0, kind: input, shape index: {}]   ;;  %s1037_s1 = inlined_call_operand.vmem [shape: f32[128,1024], index: 1, kind: input, shape index: {}]   ;;  %s1038_s2 = inlined_call_operand.vmem [shape: f32[8,1024], index: 2, kind: output, shape index: {}]  }
   0x1   :  { %s774_s11 = smov 0   ;;  %s776_s12 = smov 0  }
   0x2   :  { %s778_s13 = smov 0  }
   0x3 LB: > { %s24_s14 = sadd.s32 1, %s748_s12  ;;  %p66_p1 = scmp.ne.s32.totalorder %s740_s10, %s736_s9  ;;  %s752_s13 = sphi %s778_s13, %s12_s13   ;;  %s748_s12 = sphi %s776_s12, %s1042_s12   ;;  %s744_s11 = sphi %s774_s11, %s1041_s11   ;;  %s740_s10 = sphi %s772_s10, %s1040_s10   ;;  %s736_s9 = sphi %s770_s9, %s1039_s9  }
   0x4   : > { %p26_p0 = scmp.ge.s32.totalorder %s24_s14, 2  ;;  %p67_p2 = scmp.eq.s32.totalorder %s752_s13, 0 }
   0x5   : > { %s59_s16 = sadd.s32 1, %s740_s10  ;;  %p662_p5 = scmp.ge.s32.totalorder %s752_s13, 2 }
   0x6   : > { %s1044_s14 = smov (%p26_p0, %s24_s14), 0  ;;  %p68_p3 = por %p67_p2, %p66_p1 }
   0x7   : > { %s55_s15 = ssub.s32 %s748_s12, %s1044_s14  ;;  %125 = sbr.rel (%p662_p5) target bundleno = 48 (0x30), region = 20 }
   0x8   : > { %p57_p4 = scmp.eq.s32.totalorder %s55_s15, 0 }
   0xa   : > { %s805_s17 = scalar_select %p57_p4, %s740_s10, %s59_s16  }
   0xc   : > { %128 = sbr.rel (!%p68_p3) target bundleno = 48 (0x30), region = 24  ;;  %s130_s18 = sand.u32 (%p68_p3), 1, %s740_s10  }
   0xd   : > { %s672_s19 = sshll.u32 (%p68_p3), %s748_s12, 5  ;;  %s663_s20 = sshll.u32 (%p68_p3), %s130_s18, 9 }
   0xe   : > { %s813_s23 = scalar_lea.vmem (%p68_p3), %s1037_s1, %s672_s19  ;;  %s818_s24 = scalar_lea.vmem (%p68_p3), [#allocation3], %s663_s20 }
   0xf   : > { %v151_v0 = vld [vmem:[%s813_s23] sm:$0xff] (%p68_p3)  ;;  %v153_v1 = vld [vmem:[%s813_s23 + $0x8] sm:$0xff] (%p68_p3)  ;;  %v155_v2 = vld [vmem:[%s813_s23 + $0x10] sm:$0xff] (%p68_p3) }
  0x10   : > { %152 = vst [vmem:[%s818_s24] sm:$0xff] (%p68_p3), %v151_v0  ;;  %154 = vst [vmem:[%s818_s24 + $0x8] sm:$0xff] (%p68_p3), %v153_v1  ;;  %v157_v3 = vld [vmem:[%s813_s23 + $0x18] sm:$0xff] (%p68_p3)  ;;  %v159_v4 = vld [vmem:[%s813_s23 + $0x40] sm:$0xff] (%p68_p3) }
  0x11   : > { %156 = vst [vmem:[%s818_s24 + $0x10] sm:$0xff] %v155_v2  ;;  %v161_v5 = vld [vmem:[%s813_s23 + $0x48] sm:$0xff]  ;;  %158 = vst [vmem:[%s818_s24 + $0x18] sm:$0xff] %v157_v3  ;;  %v163_v6 = vld [vmem:[%s813_s23 + $0x50] sm:$0xff] }
  0x12   : > { %160 = vst [vmem:[%s818_s24 + $0x20] sm:$0xff] %v159_v4  ;;  %162 = vst [vmem:[%s818_s24 + $0x28] sm:$0xff] %v161_v5  ;;  %v165_v7 = vld [vmem:[%s813_s23 + $0x58] sm:$0xff]  ;;  %v167_v8 = vld [vmem:[%s813_s23 + $0x80] sm:$0xff] }
  0x13   : > { %164 = vst [vmem:[%s818_s24 + $0x30] sm:$0xff] %v163_v6  ;;  %166 = vst [vmem:[%s818_s24 + $0x38] sm:$0xff] %v165_v7  ;;  %v169_v9 = vld [vmem:[%s813_s23 + $0x88] sm:$0xff]  ;;  %v171_v10 = vld [vmem:[%s813_s23 + $0x90] sm:$0xff] }
  0x14   : > { %168 = vst [vmem:[%s818_s24 + $0x40] sm:$0xff] %v167_v8  ;;  %v173_v11 = vld [vmem:[%s813_s23 + $0x98] sm:$0xff]  ;;  %170 = vst [vmem:[%s818_s24 + $0x48] sm:$0xff] %v169_v9  ;;  %v175_v12 = vld [vmem:[%s813_s23 + $0xc0] sm:$0xff] }
  0x15   : > { %172 = vst [vmem:[%s818_s24 + $0x50] sm:$0xff] %v171_v10  ;;  %174 = vst [vmem:[%s818_s24 + $0x58] sm:$0xff] %v173_v11  ;;  %v177_v13 = vld [vmem:[%s813_s23 + $0xc8] sm:$0xff]  ;;  %v179_v14 = vld [vmem:[%s813_s23 + $0xd0] sm:$0xff] }
  0x16   : > { %176 = vst [vmem:[%s818_s24 + $0x60] sm:$0xff] %v175_v12  ;;  %178 = vst [vmem:[%s818_s24 + $0x68] sm:$0xff] %v177_v13  ;;  %v181_v15 = vld [vmem:[%s813_s23 + $0xd8] sm:$0xff]  ;;  %v183_v16 = vld [vmem:[%s813_s23 + $0x100] sm:$0xff] }
  0x17   : > { %180 = vst [vmem:[%s818_s24 + $0x70] sm:$0xff] %v179_v14  ;;  %v185_v17 = vld [vmem:[%s813_s23 + $0x108] sm:$0xff]  ;;  %182 = vst [vmem:[%s818_s24 + $0x78] sm:$0xff] %v181_v15  ;;  %v187_v18 = vld [vmem:[%s813_s23 + $0x110] sm:$0xff] }
  0x18   : > { %184 = vst [vmem:[%s818_s24 + $0x80] sm:$0xff] %v183_v16  ;;  %186 = vst [vmem:[%s818_s24 + $0x88] sm:$0xff] %v185_v17  ;;  %v189_v19 = vld [vmem:[%s813_s23 + $0x118] sm:$0xff]  ;;  %v191_v20 = vld [vmem:[%s813_s23 + $0x140] sm:$0xff] }
  0x19   : > { %188 = vst [vmem:[%s818_s24 + $0x90] sm:$0xff] %v187_v18  ;;  %190 = vst [vmem:[%s818_s24 + $0x98] sm:$0xff] %v189_v19  ;;  %v193_v21 = vld [vmem:[%s813_s23 + $0x148] sm:$0xff]  ;;  %v195_v22 = vld [vmem:[%s813_s23 + $0x150] sm:$0xff] }
  0x1a   : > { %192 = vst [vmem:[%s818_s24 + $0xa0] sm:$0xff] %v191_v20  ;;  %v197_v23 = vld [vmem:[%s813_s23 + $0x158] sm:$0xff]  ;;  %194 = vst [vmem:[%s818_s24 + $0xa8] sm:$0xff] %v193_v21  ;;  %v199_v24 = vld [vmem:[%s813_s23 + $0x180] sm:$0xff] }
  0x1b   : > { %196 = vst [vmem:[%s818_s24 + $0xb0] sm:$0xff] %v195_v22  ;;  %198 = vst [vmem:[%s818_s24 + $0xb8] sm:$0xff] %v197_v23  ;;  %v201_v25 = vld [vmem:[%s813_s23 + $0x188] sm:$0xff]  ;;  %v203_v26 = vld [vmem:[%s813_s23 + $0x190] sm:$0xff] }
  0x1c   : > { %200 = vst [vmem:[%s818_s24 + $0xc0] sm:$0xff] %v199_v24  ;;  %202 = vst [vmem:[%s818_s24 + $0xc8] sm:$0xff] %v201_v25  ;;  %v205_v27 = vld [vmem:[%s813_s23 + $0x198] sm:$0xff]  ;;  %v207_v28 = vld [vmem:[%s813_s23 + $0x1c0] sm:$0xff] }
  0x1d   : > { %204 = vst [vmem:[%s818_s24 + $0xd0] sm:$0xff] %v203_v26  ;;  %v209_v29 = vld [vmem:[%s813_s23 + $0x1c8] sm:$0xff]  ;;  %206 = vst [vmem:[%s818_s24 + $0xd8] sm:$0xff] %v205_v27  ;;  %v211_v30 = vld [vmem:[%s813_s23 + $0x1d0] sm:$0xff] }
  0x1e   : > { %208 = vst [vmem:[%s818_s24 + $0xe0] sm:$0xff] %v207_v28  ;;  %210 = vst [vmem:[%s818_s24 + $0xe8] sm:$0xff] %v209_v29  ;;  %v213_v31 = vld [vmem:[%s813_s23 + $0x1d8] sm:$0xff]  ;;  %v215_v32 = vld [vmem:[%s813_s23 + $0x200] sm:$0xff] }
  0x1f   : > { %212 = vst [vmem:[%s818_s24 + $0xf0] sm:$0xff] %v211_v30  ;;  %214 = vst [vmem:[%s818_s24 + $0xf8] sm:$0xff] %v213_v31  ;;  %v217_v33 = vld [vmem:[%s813_s23 + $0x208] sm:$0xff]  ;;  %v219_v34 = vld [vmem:[%s813_s23 + $0x210] sm:$0xff] }
  0x20   : > { %216 = vst [vmem:[%s818_s24 + $0x100] sm:$0xff] %v215_v32  ;;  %v221_v35 = vld [vmem:[%s813_s23 + $0x218] sm:$0xff]  ;;  %218 = vst [vmem:[%s818_s24 + $0x108] sm:$0xff] %v217_v33  ;;  %v223_v36 = vld [vmem:[%s813_s23 + $0x240] sm:$0xff] }
  0x21   : > { %220 = vst [vmem:[%s818_s24 + $0x110] sm:$0xff] %v219_v34  ;;  %222 = vst [vmem:[%s818_s24 + $0x118] sm:$0xff] %v221_v35  ;;  %v225_v37 = vld [vmem:[%s813_s23 + $0x248] sm:$0xff]  ;;  %v227_v38 = vld [vmem:[%s813_s23 + $0x250] sm:$0xff] }
  0x22   : > { %224 = vst [vmem:[%s818_s24 + $0x120] sm:$0xff] %v223_v36  ;;  %226 = vst [vmem:[%s818_s24 + $0x128] sm:$0xff] %v225_v37  ;;  %v229_v39 = vld [vmem:[%s813_s23 + $0x258] sm:$0xff]  ;;  %v231_v40 = vld [vmem:[%s813_s23 + $0x280] sm:$0xff] }
  0x23   : > { %228 = vst [vmem:[%s818_s24 + $0x130] sm:$0xff] %v227_v38  ;;  %v233_v41 = vld [vmem:[%s813_s23 + $0x288] sm:$0xff]  ;;  %230 = vst [vmem:[%s818_s24 + $0x138] sm:$0xff] %v229_v39  ;;  %v235_v42 = vld [vmem:[%s813_s23 + $0x290] sm:$0xff] }
  0x24   : > { %232 = vst [vmem:[%s818_s24 + $0x140] sm:$0xff] %v231_v40  ;;  %234 = vst [vmem:[%s818_s24 + $0x148] sm:$0xff] %v233_v41  ;;  %v237_v43 = vld [vmem:[%s813_s23 + $0x298] sm:$0xff]  ;;  %v239_v44 = vld [vmem:[%s813_s23 + $0x2c0] sm:$0xff] }
  0x25   : > { %236 = vst [vmem:[%s818_s24 + $0x150] sm:$0xff] %v235_v42  ;;  %238 = vst [vmem:[%s818_s24 + $0x158] sm:$0xff] %v237_v43  ;;  %v241_v45 = vld [vmem:[%s813_s23 + $0x2c8] sm:$0xff]  ;;  %v243_v46 = vld [vmem:[%s813_s23 + $0x2d0] sm:$0xff] }
  0x26   : > { %240 = vst [vmem:[%s818_s24 + $0x160] sm:$0xff] %v239_v44  ;;  %v245_v47 = vld [vmem:[%s813_s23 + $0x2d8] sm:$0xff]  ;;  %242 = vst [vmem:[%s818_s24 + $0x168] sm:$0xff] %v241_v45  ;;  %v247_v48 = vld [vmem:[%s813_s23 + $0x300] sm:$0xff] }
  0x27   : > { %244 = vst [vmem:[%s818_s24 + $0x170] sm:$0xff] %v243_v46  ;;  %246 = vst [vmem:[%s818_s24 + $0x178] sm:$0xff] %v245_v47  ;;  %v249_v49 = vld [vmem:[%s813_s23 + $0x308] sm:$0xff]  ;;  %v251_v50 = vld [vmem:[%s813_s23 + $0x310] sm:$0xff] }
  0x28   : > { %248 = vst [vmem:[%s818_s24 + $0x180] sm:$0xff] %v247_v48  ;;  %250 = vst [vmem:[%s818_s24 + $0x188] sm:$0xff] %v249_v49  ;;  %v253_v51 = vld [vmem:[%s813_s23 + $0x318] sm:$0xff]  ;;  %v255_v52 = vld [vmem:[%s813_s23 + $0x340] sm:$0xff] }
  0x29   : > { %252 = vst [vmem:[%s818_s24 + $0x190] sm:$0xff] %v251_v50  ;;  %v257_v53 = vld [vmem:[%s813_s23 + $0x348] sm:$0xff]  ;;  %254 = vst [vmem:[%s818_s24 + $0x198] sm:$0xff] %v253_v51  ;;  %v259_v54 = vld [vmem:[%s813_s23 + $0x350] sm:$0xff] }
  0x2a   : > { %256 = vst [vmem:[%s818_s24 + $0x1a0] sm:$0xff] %v255_v52  ;;  %258 = vst [vmem:[%s818_s24 + $0x1a8] sm:$0xff] %v257_v53  ;;  %v261_v55 = vld [vmem:[%s813_s23 + $0x358] sm:$0xff]  ;;  %v263_v56 = vld [vmem:[%s813_s23 + $0x380] sm:$0xff] }
  0x2b   : > { %260 = vst [vmem:[%s818_s24 + $0x1b0] sm:$0xff] %v259_v54  ;;  %262 = vst [vmem:[%s818_s24 + $0x1b8] sm:$0xff] %v261_v55  ;;  %v265_v57 = vld [vmem:[%s813_s23 + $0x388] sm:$0xff]  ;;  %v267_v58 = vld [vmem:[%s813_s23 + $0x390] sm:$0xff] }
  0x2c   : > { %264 = vst [vmem:[%s818_s24 + $0x1c0] sm:$0xff] %v263_v56  ;;  %v269_v59 = vld [vmem:[%s813_s23 + $0x398] sm:$0xff]  ;;  %266 = vst [vmem:[%s818_s24 + $0x1c8] sm:$0xff] %v265_v57  ;;  %v271_v60 = vld [vmem:[%s813_s23 + $0x3c0] sm:$0xff] }
  0x2d   : > { %268 = vst [vmem:[%s818_s24 + $0x1d0] sm:$0xff] %v267_v58  ;;  %270 = vst [vmem:[%s818_s24 + $0x1d8] sm:$0xff] %v269_v59  ;;  %v273_v61 = vld [vmem:[%s813_s23 + $0x3c8] sm:$0xff]  ;;  %v275_v62 = vld [vmem:[%s813_s23 + $0x3d0] sm:$0xff] }
  0x2e   : > { %272 = vst [vmem:[%s818_s24 + $0x1e0] sm:$0xff] %v271_v60  ;;  %274 = vst [vmem:[%s818_s24 + $0x1e8] sm:$0xff] %v273_v61  ;;  %v277_v63 = vld [vmem:[%s813_s23 + $0x3d8] sm:$0xff] }
  0x2f   : > { %276 = vst [vmem:[%s818_s24 + $0x1f0] sm:$0xff] %v275_v62  ;;  %278 = vst [vmem:[%s818_s24 + $0x1f8] sm:$0xff] %v277_v63 }
  0x30 PF: > { %p666_p6 = scmp.ge.s32.totalorder %s752_s13, 1  ;;  %p283_p7 = scmp.lt.s32.totalorder %s752_s13, 3 }
  0x32   : > { %p284_p8 = pnand %p666_p6, %p283_p7 }
  0x33   : > { %s290_s25 = sand.u32 (!%p284_p8), 1, %s736_s9   ;;  %s668_s30 = sshll.u32 (!%p284_p8), %s744_s11, 2 }
  0x34   : > { %287 = sbr.rel (%p284_p8) target bundleno = 289 (0x121), region = 47  ;;  %s667_s26 = sshll.u32 (!%p284_p8), %s290_s25, 9 }
  0x35   : > { %s948_s27 = scalar_lea.vmem (!%p284_p8), [#allocation3], %s667_s26  ;;  %p322_p9 = scmp.lt.s32.totalorder (!%p284_p8), %s668_s30, 7 }
  0x39   : > { %v754_v0 = vmov 0.0   ;;  %v401_v1 = vld [vmem:[%s948_s27 + $0x1e8] sm:$0xff]  ;;  %v403_v2 = vld [vmem:[%s948_s27 + $0x1f8] sm:$0xff]  ;;  %v400_v3 = vld [vmem:[%s948_s27 + $0x1e0] sm:$0xff]  ;;  %s1046_s30 = smov (!%p322_p9, %s668_s30), 7 }
  0x3a   : > { %468 = vmatprep.mubr.f32.mxu0 %v754_v0  ;;  %539 = vmatprep.mubr.f32.mxu1 %v754_v0  ;;  %v402_v4 = vld [vmem:[%s948_s27 + $0x1f0] sm:$0xff]  ;;  %v397_v5 = vld [vmem:[%s948_s27 + $0x1c8] sm:$0xff]  ;;  %v399_v6 = vld [vmem:[%s948_s27 + $0x1d8] sm:$0xff]  ;;  %s669_s3 = sshll.u32 %s1046_s30, 3 }
  0x3b   : > { %404 = vmatprep.subr.mxu0 %v401_v1  ;;  %475 = vmatprep.subr.mxu1 %v403_v2  ;;  %v396_v7 = vld [vmem:[%s948_s27 + $0x1c0] sm:$0xff]  ;;  %v398_v8 = vld [vmem:[%s948_s27 + $0x1d0] sm:$0xff]  ;;  %v393_v9 = vld [vmem:[%s948_s27 + $0x1a8] sm:$0xff]  ;;  %s325_s6 = scalar_lea.vmem %s1038_s2, %s669_s3 }
  0x3c   : > { %405 = vmatpush1.msra.mxu0 %v400_v3  ;;  %476 = vmatpush1.msra.mxu1 %v402_v4  ;;  %v395_v10 = vld [vmem:[%s948_s27 + $0x1b8] sm:$0xff]  ;;  %v392_v11 = vld [vmem:[%s948_s27 + $0x1a0] sm:$0xff]  ;;  %v394_v12 = vld [vmem:[%s948_s27 + $0x1b0] sm:$0xff] }
  0x3d   : > { %406 = vmatprep.subr.mxu0 %v397_v5  ;;  %477 = vmatprep.subr.mxu1 %v399_v6  ;;  %v389_v13 = vld [vmem:[%s948_s27 + $0x188] sm:$0xff]  ;;  %v391_v14 = vld [vmem:[%s948_s27 + $0x198] sm:$0xff]  ;;  %v388_v15 = vld [vmem:[%s948_s27 + $0x180] sm:$0xff] }
  0x3e   : > { %407 = vmatpush1.msra.mxu0 %v396_v7  ;;  %478 = vmatpush1.msra.mxu1 %v398_v8  ;;  %v390_v16 = vld [vmem:[%s948_s27 + $0x190] sm:$0xff]  ;;  %v385_v17 = vld [vmem:[%s948_s27 + $0x168] sm:$0xff]  ;;  %v387_v18 = vld [vmem:[%s948_s27 + $0x178] sm:$0xff] }
  0x3f   : > { %408 = vmatprep.subr.mxu0 %v393_v9  ;;  %479 = vmatprep.subr.mxu1 %v395_v10  ;;  %v384_v19 = vld [vmem:[%s948_s27 + $0x160] sm:$0xff]  ;;  %v386_v20 = vld [vmem:[%s948_s27 + $0x170] sm:$0xff]  ;;  %v381_v21 = vld [vmem:[%s948_s27 + $0x148] sm:$0xff] }
  0x40   : > { %409 = vmatpush1.msra.mxu0 %v392_v11  ;;  %480 = vmatpush1.msra.mxu1 %v394_v12  ;;  %v383_v22 = vld [vmem:[%s948_s27 + $0x158] sm:$0xff]  ;;  %v380_v23 = vld [vmem:[%s948_s27 + $0x140] sm:$0xff]  ;;  %v382_v24 = vld [vmem:[%s948_s27 + $0x150] sm:$0xff] }
  0x41   : > { %410 = vmatprep.subr.mxu0 %v389_v13  ;;  %481 = vmatprep.subr.mxu1 %v391_v14  ;;  %v377_v25 = vld [vmem:[%s948_s27 + $0x128] sm:$0xff]  ;;  %v379_v26 = vld [vmem:[%s948_s27 + $0x138] sm:$0xff]  ;;  %v376_v27 = vld [vmem:[%s948_s27 + $0x120] sm:$0xff] }
  0x42   : > { %411 = vmatpush1.msra.mxu0 %v388_v15  ;;  %482 = vmatpush1.msra.mxu1 %v390_v16  ;;  %v378_v28 = vld [vmem:[%s948_s27 + $0x130] sm:$0xff]  ;;  %v373_v29 = vld [vmem:[%s948_s27 + $0x108] sm:$0xff]  ;;  %v375_v30 = vld [vmem:[%s948_s27 + $0x118] sm:$0xff] }
  0x43   : > { %412 = vmatprep.subr.mxu0 %v385_v17  ;;  %483 = vmatprep.subr.mxu1 %v387_v18  ;;  %v372_v31 = vld [vmem:[%s948_s27 + $0x100] sm:$0xff]  ;;  %v374_v32 = vld [vmem:[%s948_s27 + $0x110] sm:$0xff]  ;;  %v369_v33 = vld [vmem:[%s948_s27 + $0xe8] sm:$0xff] }
  0x44   : > { %413 = vmatpush1.msra.mxu0 %v384_v19  ;;  %484 = vmatpush1.msra.mxu1 %v386_v20  ;;  %v371_v34 = vld [vmem:[%s948_s27 + $0xf8] sm:$0xff]  ;;  %v368_v35 = vld [vmem:[%s948_s27 + $0xe0] sm:$0xff]  ;;  %v370_v36 = vld [vmem:[%s948_s27 + $0xf0] sm:$0xff] }
  0x45   : > { %414 = vmatprep.subr.mxu0 %v381_v21  ;;  %485 = vmatprep.subr.mxu1 %v383_v22  ;;  %v365_v37 = vld [vmem:[%s948_s27 + $0xc8] sm:$0xff]  ;;  %v367_v38 = vld [vmem:[%s948_s27 + $0xd8] sm:$0xff]  ;;  %v364_v39 = vld [vmem:[%s948_s27 + $0xc0] sm:$0xff] }
  0x46   : > { %415 = vmatpush1.msra.mxu0 %v380_v23  ;;  %486 = vmatpush1.msra.mxu1 %v382_v24  ;;  %v366_v40 = vld [vmem:[%s948_s27 + $0xd0] sm:$0xff]  ;;  %v361_v41 = vld [vmem:[%s948_s27 + $0xa8] sm:$0xff]  ;;  %v363_v42 = vld [vmem:[%s948_s27 + $0xb8] sm:$0xff] }
  0x47   : > { %416 = vmatprep.subr.mxu0 %v377_v25  ;;  %487 = vmatprep.subr.mxu1 %v379_v26  ;;  %v360_v43 = vld [vmem:[%s948_s27 + $0xa0] sm:$0xff]  ;;  %v362_v44 = vld [vmem:[%s948_s27 + $0xb0] sm:$0xff]  ;;  %v357_v45 = vld [vmem:[%s948_s27 + $0x88] sm:$0xff] }
  0x48   : > { %417 = vmatpush1.msra.mxu0 %v376_v27  ;;  %488 = vmatpush1.msra.mxu1 %v378_v28  ;;  %v359_v46 = vld [vmem:[%s948_s27 + $0x98] sm:$0xff]  ;;  %v356_v47 = vld [vmem:[%s948_s27 + $0x80] sm:$0xff]  ;;  %v358_v48 = vld [vmem:[%s948_s27 + $0x90] sm:$0xff] }
  0x49   : > { %418 = vmatprep.subr.mxu0 %v373_v29  ;;  %489 = vmatprep.subr.mxu1 %v375_v30  ;;  %v353_v49 = vld [vmem:[%s948_s27 + $0x68] sm:$0xff]  ;;  %v355_v50 = vld [vmem:[%s948_s27 + $0x78] sm:$0xff]  ;;  %v352_v51 = vld [vmem:[%s948_s27 + $0x60] sm:$0xff] }
  0x4a   : > { %419 = vmatpush1.msra.mxu0 %v372_v31  ;;  %490 = vmatpush1.msra.mxu1 %v374_v32  ;;  %v354_v52 = vld [vmem:[%s948_s27 + $0x70] sm:$0xff]  ;;  %v349_v53 = vld [vmem:[%s948_s27 + $0x48] sm:$0xff]  ;;  %v351_v54 = vld [vmem:[%s948_s27 + $0x58] sm:$0xff] }
  0x4b   : > { %420 = vmatprep.subr.mxu0 %v369_v33  ;;  %491 = vmatprep.subr.mxu1 %v371_v34  ;;  %v348_v55 = vld [vmem:[%s948_s27 + $0x40] sm:$0xff]  ;;  %v350_v56 = vld [vmem:[%s948_s27 + $0x50] sm:$0xff]  ;;  %v345_v57 = vld [vmem:[%s948_s27 + $0x28] sm:$0xff] }
  0x4c   : > { %421 = vmatpush1.msra.mxu0 %v368_v35  ;;  %492 = vmatpush1.msra.mxu1 %v370_v36  ;;  %v347_v58 = vld [vmem:[%s948_s27 + $0x38] sm:$0xff]  ;;  %v344_v59 = vld [vmem:[%s948_s27 + $0x20] sm:$0xff]  ;;  %v346_v60 = vld [vmem:[%s948_s27 + $0x30] sm:$0xff] }
  0x4d   : > { %422 = vmatprep.subr.mxu0 %v365_v37  ;;  %493 = vmatprep.subr.mxu1 %v367_v38  ;;  %v341_v61 = vld [vmem:[%s948_s27 + $0x8] sm:$0xff]  ;;  %v343_v62 = vld [vmem:[%s948_s27 + $0x18] sm:$0xff]  ;;  %v340_v63 = vld [vmem:[%s948_s27] sm:$0xff] }
  0x4e   : > { %423 = vmatpush1.msra.mxu0 %v364_v39  ;;  %494 = vmatpush1.msra.mxu1 %v366_v40  ;;  %v342_v0 = vld [vmem:[%s948_s27 + $0x10] sm:$0xff]  ;;  %v339_v1 = vld [vmem:[%s1036_s0] sm:$0xff] }
  0x4f   : > { %424 = vmatprep.subr.mxu0 %v361_v41  ;;  %495 = vmatprep.subr.mxu1 %v363_v42 }
  0x50   : > { %425 = vmatpush1.msra.mxu0 %v360_v43  ;;  %496 = vmatpush1.msra.mxu1 %v362_v44 }
  0x51   : > { %426 = vmatprep.subr.mxu0 %v357_v45  ;;  %497 = vmatprep.subr.mxu1 %v359_v46 }
  0x52   : > { %427 = vmatpush1.msra.mxu0 %v356_v47  ;;  %498 = vmatpush1.msra.mxu1 %v358_v48 }
  0x53   : > { %428 = vmatprep.subr.mxu0 %v353_v49  ;;  %499 = vmatprep.subr.mxu1 %v355_v50 }
  0x54   : > { %429 = vmatpush1.msra.mxu0 %v352_v51  ;;  %500 = vmatpush1.msra.mxu1 %v354_v52 }
  0x55   : > { %430 = vmatprep.subr.mxu0 %v349_v53  ;;  %501 = vmatprep.subr.mxu1 %v351_v54 }
  0x56   : > { %431 = vmatpush1.msra.mxu0 %v348_v55  ;;  %502 = vmatpush1.msra.mxu1 %v350_v56 }
  0x57   : > { %432 = vmatprep.subr.mxu0 %v345_v57  ;;  %503 = vmatprep.subr.mxu1 %v347_v58 }
  0x58   : > { %433 = vmatpush1.msra.mxu0 %v344_v59  ;;  %504 = vmatpush1.msra.mxu1 %v346_v60 }
  0x59   : > { %434 = vmatprep.subr.mxu0 %v341_v61  ;;  %505 = vmatprep.subr.mxu1 %v343_v62 }
  0x5a   : > { %435 = vmatpush1.msra.mxu0 %v340_v63  ;;  %506 = vmatpush1.msra.mxu1 %v342_v0 }
  0x5b   : > { %469 = vmatmul.mubr.f32.vlgmr.msra.gmra.mxu0 %v339_v1  ;;  %540 = vmatmul.mubr.f32.vlgmr.msra.gmra.mxu1 %v339_v1 }
 0x11b   : > { %v470_v2 = vpop.f32.mrf.mxu0  ;;  %v541_v3 = vpop.f32.mrf.mxu1 }
 0x11c   : > { %v561_v4 = vmax.f32 %v470_v2, 0.0  ;;  %v563_v5 = vmax.f32 %v541_v3, 0.0 }
 0x11d   : > { %v472_v6 = vpop.f32.mrf.mxu0  ;;  %v543_v7 = vpop.f32.mrf.mxu1 }
 0x11e   : > { %565 = vst [vmem:[%s325_s6] sm:$0xff] %v561_v4  ;;  %v562_v8 = vmax.f32 %v472_v6, 0.0  ;;  %v564_v9 = vmax.f32 %v543_v7, 0.0  ;;  %567 = vst [vmem:[%s325_s6 + $0x10] sm:$0xff] %v563_v5 }
 0x120   : > { %566 = vst [vmem:[%s325_s6 + $0x8] sm:$0xff] %v562_v8  ;;  %568 = vst [vmem:[%s325_s6 + $0x18] sm:$0xff] %v564_v9 }
 0x121 PF: > { %s12_s13 = sadd.s32 1, %s752_s13   ;;  %s1039_s9 = smov %s740_s10 }
 0x122   : > { %p9_p10 = scmp.ge.s32.totalorder %s12_s13, 4   ;;  %s1040_s10 = smov %s805_s17 }
 0x123   : > { %s1041_s11 = smov %s748_s12  ;;  %s1042_s12 = smov %s1044_s14 }
 0x124   :  { %11 = sbr.rel (!%p9_p10) target bundleno = 3 (0x3), region = 97 }

</bundles_post_ra>
